<compile_context>
chip_gen: v5e
topology: v5e:2x2
jax: 0.10.0
libtpu: 0.0.40
codegen_flags: <defaults>
</compile_context>

<pallas_src>
import functools
import math

import jax
import jax.numpy as jnp
import numpy as np
from jax import lax
from jax.experimental import pallas as pl
from jax.experimental.pallas import tpu as pltpu


# ------------------------------ Pallas kernels ------------------------------ #

def _query_prep_kernel(lhs_ref, rel_ref, time_ref, rhs_ref,
                       q_ref, reg_lhs_ref, reg_rel_ref, reg_rhs_ref, *, rank):
    """Per-batch-tile query-side work (done once, independent of entities).

    Inputs  (b_tile, 2R): gathered lhs / rel / time / rhs embedding rows.
    Outputs:
      q_ref       (b_tile, Kp): [q_re | q_im | zeros]  (stream dtype)
      reg_*_ref   (b_tile, R):  N3 magnitudes sqrt(re^2 + im^2)  (f32)
    """
    lhs = lhs_ref[...]
    rel = rel_ref[...]
    t = time_ref[...]
    rhs = rhs_ref[...]

    lhs_re, lhs_im = lhs[:, :rank], lhs[:, rank:]
    rel_re, rel_im = rel[:, :rank], rel[:, rank:]
    t_re, t_im = t[:, :rank], t[:, rank:]
    rhs_re, rhs_im = rhs[:, :rank], rhs[:, rank:]

    # full_rel = rel * time (complex)
    fr_re = rel_re * t_re - rel_im * t_im
    fr_im = rel_im * t_re + rel_re * t_im

    # q = lhs * full_rel (complex)
    q_re = lhs_re * fr_re - lhs_im * fr_im
    q_im = lhs_im * fr_re + lhs_re * fr_im

    # Emit [q_re | q_im | 0-pad] directly as one lane-dense slab.
    if q_ref.shape[1] != 2 * rank:          # static (trace-time) condition
        q_ref[...] = jnp.zeros_like(q_ref)
    q_ref[:, :rank] = q_re.astype(q_ref.dtype)
    q_ref[:, rank:2 * rank] = q_im.astype(q_ref.dtype)

    reg_lhs_ref[...] = jnp.sqrt(lhs_re * lhs_re + lhs_im * lhs_im)
    reg_rel_ref[...] = jnp.sqrt(fr_re * fr_re + fr_im * fr_im)
    reg_rhs_ref[...] = jnp.sqrt(rhs_re * rhs_re + rhs_im * rhs_im)


def _score_kernel(q_ref, ent_ref, out_ref):
    """out[b_tile, n_tile] = q_full @ ent_tile^T  (contraction on Kp axis).

    q_ref:   (b_tile, Kp)  query block (constant along the entity axis)
    ent_ref: (n_tile, Kp)  un-split, padded entity embedding tile
    out_ref: (b_tile, n_tile)
    """
    e = ent_ref[...]
    q = q_ref[...].astype(e.dtype)          # no-op: q is emitted in stream dtype
    out_ref[...] = lax.dot_general(
        q, e,
        dimension_numbers=(((1,), (1,)), ((), ())),
        preferred_element_type=jnp.float32,
    ).astype(out_ref.dtype)


# -------------------------------- Helpers ----------------------------------- #

def _round_up(a, b):
    return -(-a // b) * b


@functools.lru_cache(maxsize=None)
def _vmem_capacity_bytes():
    """Generation-aware VMEM capacity (v5e/v6e 128 MiB, v7x 64 MiB per TC)."""
    try:
        cap = int(getattr(pltpu.get_tpu_info(), "vmem_capacity_bytes", 0))
        if cap > 0:
            return cap
    except Exception:
        pass
    return 64 * 1024 * 1024      # conservative fallback (v7x per-TC)


def _vmem_budget_bytes():
    return int(0.55 * _vmem_capacity_bytes())


def _vmem_limit_bytes():
    return int(0.80 * _vmem_capacity_bytes())


def _choose_tile_n(n_ent, k_pad, ent_bytes, *, desired=1024):
    """Largest lane-aligned entity tile that fits the VMEM budget.

    Deterministic given table-side info only (batch tile assumed <= 256), so
    prepare_entity_stream() and tcomplex_forward() agree on the tile.
    """
    budget = _vmem_budget_bytes()
    n128 = _round_up(max(n_ent, 128), 128)
    tile = min(_round_up(desired, 128), n128)
    tile = max(128, (tile // 128) * 128)

    b_assumed = 256                              # upper bound on batch tile

    def footprint(t):
        ent = 2 * t * k_pad * ent_bytes          # double-buffered entity tile
        out = 2 * b_assumed * t * 4              # double-buffered f32 output
        q = 2 * b_assumed * k_pad * 4            # query slab
        return ent + out + q

    while tile > 128 and footprint(tile) > budget:
        tile -= 128
    return tile


def _choose_batch_tile(batch, two_rank, rank, k_pad):
    """Batch tile (multiple of 8, <=256) bounded by the query-prep footprint."""
    budget = _vmem_budget_bytes()
    bt = min(_round_up(max(batch, 1), 8), 256)
    per_row = 2 * (4 * two_rank + k_pad + 3 * rank) * 4   # double-buffered f32
    while bt > 8 and bt * per_row > budget:
        bt -= 8
    return bt


def prepare_entity_stream(ent_emb, *, stream_dtype=jnp.bfloat16, tile_n=1024):
    """Pad + cast the entity table ONCE (hoisted out of the per-call path).

    Pads N to a multiple of the chosen entity tile and 2R to a multiple of 128
    (zeros, so results are exact), and casts to `stream_dtype` (default bf16
    to halve streamed HBM bytes on this bandwidth-bound kernel).
    """
    n_ent, two_rank = ent_emb.shape
    k_pad = _round_up(two_rank, 128)
    ent_bytes = jnp.dtype(stream_dtype).itemsize
    tile = _choose_tile_n(n_ent, k_pad, ent_bytes, desired=tile_n)
    n_pad = _round_up(n_ent, tile)
    ent = ent_emb.astype(stream_dtype)
    return jnp.pad(ent, ((0, n_pad - n_ent), (0, k_pad - two_rank)))


# --------------------------------- Wrapper ----------------------------------- #

def tcomplex_forward(params, x, *, no_time_emb=False, ent_stream=None,
                     ent_stream_dtype=jnp.bfloat16, tile_n=1024):
    """Pallas implementation of TComplEx.forward.

    params:     (ent_emb [N, 2R], rel_emb [P, 2R], time_emb [T, 2R]) float32
    x:          int32 queries [B, 4] = (lhs, rel, rhs, timestamp)
    ent_stream: optional pre-padded / pre-cast entity table from
                prepare_entity_stream() (recommended: avoids a per-call copy
                of the whole table).  If None it is built inside the call.
    Returns (scores [B, N],
             (|lhs| [B, R], |full_rel| [B, R], |rhs| [B, R]),
             time embedding weight).
    Numerics: exact vs. the f32 reference when the entity stream is f32; with
    the default bf16 stream the scores carry ~bf16 relative error.
    """
    ent_emb, rel_emb, time_emb = params
    n_ent, two_rank = ent_emb.shape
    rank = two_rank // 2
    batch = x.shape[0]
    k_pad = _round_up(two_rank, 128)

    if ent_stream is None:
        # Per-call pad/cast of the full table (extra HBM traffic); prefer
        # calling prepare_entity_stream() once at parameter setup.
        ent_stream = prepare_entity_stream(ent_emb, stream_dtype=ent_stream_dtype,
                                           tile_n=tile_n)
    stream_dtype = ent_stream.dtype
    ent_bytes = jnp.dtype(stream_dtype).itemsize
    n_pad = ent_stream.shape[0]
    assert ent_stream.shape[1] == k_pad, "entity stream K-padding mismatch"

    tile = _choose_tile_n(n_ent, k_pad, ent_bytes, desired=tile_n)
    if n_pad % tile:
        tile = math.gcd(n_pad, tile)     # safety net; still a multiple of 128

    vmem_limit = _vmem_limit_bytes()

    bt = _choose_batch_tile(batch, two_rank, rank, k_pad)
    b_pad = _round_up(batch, bt)
    if b_pad != batch:
        # Extra query rows use index 0 (valid); their results are sliced off.
        x = jnp.pad(x, ((0, b_pad - batch), (0, 0)))

    # Embedding gathers (glue; left to XLA).
    lhs = jnp.take(ent_emb, x[:, 0], axis=0)
    rel = jnp.take(rel_emb, x[:, 1], axis=0)
    rhs = jnp.take(ent_emb, x[:, 2], axis=0)
    time = jnp.take(time_emb, x[:, 3], axis=0)

    # ---- Kernel 1: query prep (tiled over batch), once per forward. ---------
    in_spec = pl.BlockSpec((bt, two_rank), lambda i: (i, 0))
    q_spec = pl.BlockSpec((bt, k_pad), lambda i: (i, 0))
    reg_spec = pl.BlockSpec((bt, rank), lambda i: (i, 0))
    q_full, reg_lhs, reg_rel, reg_rhs = pl.pallas_call(
        functools.partial(_query_prep_kernel, rank=rank),
        out_shape=(jax.ShapeDtypeStruct((b_pad, k_pad), stream_dtype),
                   jax.ShapeDtypeStruct((b_pad, rank), jnp.float32),
                   jax.ShapeDtypeStruct((b_pad, rank), jnp.float32),
                   jax.ShapeDtypeStruct((b_pad, rank), jnp.float32)),
        grid=(b_pad // bt,),
        in_specs=[in_spec, in_spec, in_spec, in_spec],
        out_specs=(q_spec, reg_spec, reg_spec, reg_spec),
        compiler_params=pltpu.CompilerParams(
            dimension_semantics=("parallel",),
            vmem_limit_bytes=vmem_limit),
    )(lhs, rel, time, rhs)

    # ---- Kernel 2: tiled fused matmul over all entities. --------------------
    n_batch_tiles = b_pad // bt
    flops = int(2 * b_pad * n_pad * k_pad)
    bytes_accessed = int(n_pad * k_pad * ent_bytes * n_batch_tiles
                         + b_pad * k_pad * ent_bytes
                         + b_pad * n_pad * 4)
    scores_pad = pl.pallas_call(
        _score_kernel,
        out_shape=jax.ShapeDtypeStruct((b_pad, n_pad), jnp.float32),
        grid=(n_batch_tiles, n_pad // tile),
        in_specs=[
            pl.BlockSpec((bt, k_pad), lambda bi, ni: (bi, 0)),     # query slab
            pl.BlockSpec((tile, k_pad), lambda bi, ni: (ni, 0)),   # entity tile
        ],
        out_specs=pl.BlockSpec((bt, tile), lambda bi, ni: (bi, ni)),
        compiler_params=pltpu.CompilerParams(
            dimension_semantics=("parallel", "parallel"),
            vmem_limit_bytes=vmem_limit),
        cost_estimate=pl.CostEstimate(flops=flops, transcendentals=0,
                                      bytes_accessed=bytes_accessed),
    )(q_full, ent_stream)

    scores = scores_pad[:batch, :n_ent]
    regs = (reg_lhs[:batch], reg_rel[:batch], reg_rhs[:batch])
    time_weight = time_emb[:-1] if no_time_emb else time_emb
    return scores, regs, time_weight


# ----------------------------- Pure-JAX reference ---------------------------- #

def tcomplex_forward_ref(params, x, *, no_time_emb=False):
    ent_emb, rel_emb, time_emb = params
    rank = ent_emb.shape[1] // 2

    lhs = jnp.take(ent_emb, x[:, 0], axis=0)
    rel = jnp.take(rel_emb, x[:, 1], axis=0)
    rhs = jnp.take(ent_emb, x[:, 2], axis=0)
    time = jnp.take(time_emb, x[:, 3], axis=0)

    lhs = (lhs[:, :rank], lhs[:, rank:])
    rel = (rel[:, :rank], rel[:, rank:])
    rhs = (rhs[:, :rank], rhs[:, rank:])
    time = (time[:, :rank], time[:, rank:])
    right = (ent_emb[:, :rank], ent_emb[:, rank:])

    rt = (rel[0] * time[0], rel[1] * time[0], rel[0] * time[1], rel[1] * time[1])
    full_rel = (rt[0] - rt[3], rt[1] + rt[2])

    scores = ((lhs[0] * full_rel[0] - lhs[1] * full_rel[1]) @ right[0].T
              + (lhs[1] * full_rel[0] + lhs[0] * full_rel[1]) @ right[1].T)
    regs = (jnp.sqrt(lhs[0] ** 2 + lhs[1] ** 2),
            jnp.sqrt(full_rel[0] ** 2 + full_rel[1] ** 2),
            jnp.sqrt(rhs[0] ** 2 + rhs[1] ** 2))
    time_weight = time_emb[:-1] if no_time_emb else time_emb
    return scores, regs, time_weight


# ----------------------------------- Main ------------------------------------ #

if __name__ == "__main__":
    # Small TComplEx config: sizes = (n_entities, n_predicates, n_entities,
    # n_timestamps).  n_entities / batch deliberately NOT tile multiples so the
    # padding paths are exercised.
    sizes = (300, 64, 300, 32)
    rank = 32
    init_size = 0.01
    batch = 6

    key = jax.random.PRNGKey(0)
    k_e, k_r, k_t, k_q = jax.random.split(key, 4)

    ent_emb = jax.random.normal(k_e, (sizes[0], 2 * rank), jnp.float32) * init_size
    rel_emb = jax.random.normal(k_r, (sizes[1], 2 * rank), jnp.float32) * init_size
    time_emb = jax.random.normal(k_t, (sizes[3], 2 * rank), jnp.float32) * init_size
    params = (ent_emb, rel_emb, time_emb)

    maxvals = jnp.array([sizes[0], sizes[1], sizes[0], sizes[3]], jnp.int32)
    x = (jax.random.randint(k_q, (batch, 4), 0, 1 << 30, jnp.int32)
         % maxvals).astype(jnp.int32)

    scores_ref, regs_ref, time_w_ref = tcomplex_forward_ref(params, x)
    fwd = jax.jit(tcomplex_forward)

    # 1) Exact path: f32 entity stream (prepared once, outside the call).
    ent_f32 = prepare_entity_stream(ent_emb, stream_dtype=jnp.float32)
    scores32, regs32, tw32 = jax.block_until_ready(
        fwd(params, x, ent_stream=ent_f32))
    np.testing.assert_allclose(np.asarray(scores32), np.asarray(scores_ref),
                               rtol=1e-4, atol=1e-6)
    for a, b in zip(regs32, regs_ref):
        np.testing.assert_allclose(np.asarray(a), np.asarray(b),
                                   rtol=1e-4, atol=1e-6)
    np.testing.assert_allclose(np.asarray(tw32), np.asarray(time_w_ref))

    # 2) Default fast path: bf16 entity stream (halves streamed HBM bytes).
    #    Scores carry ~bf16 relative error; regularizer terms stay exact (f32).
    ent_bf16 = prepare_entity_stream(ent_emb)   # default bf16
    scores16, regs16, _ = jax.block_until_ready(
        fwd(params, x, ent_stream=ent_bf16))
    np.testing.assert_allclose(np.asarray(scores16), np.asarray(scores_ref),
                               rtol=1e-1, atol=1e-7)
    for a, b in zip(regs16, regs_ref):
        np.testing.assert_allclose(np.asarray(a), np.asarray(b),
                                   rtol=1e-4, atol=1e-6)

    print("KERNEL_OK")
</pallas_src>

<mosaic_0001>
module attributes {stable_mosaic.version = 11 : i64} {
  func.func @_score_kernel(%arg0: i32, %arg1: i32, %arg2: memref<8x128xf32, #tpu.memory_space<vmem>>, %arg3: memref<384x128xf32, #tpu.memory_space<vmem>>, %arg4: memref<8x384xf32, #tpu.memory_space<vmem>>) attributes {dimension_semantics = [#tpu.dimension_semantics<parallel>, #tpu.dimension_semantics<parallel>], iteration_bounds = array<i64: 1, 1>, scalar_prefetch = 0 : i64, scratch_operands = 0 : i64, tpu.core_type = #tpu.core_type<tc>, window_params = [{transform_indices = @transform_0, window_bounds = array<i64: 8, 128>}, {transform_indices = @transform_1, window_bounds = array<i64: 384, 128>}, {transform_indices = @transform_2, window_bounds = array<i64: 8, 384>}]} {
    %c0 = arith.constant 0 : index
    %c0_0 = arith.constant 0 : index
    %0 = vector.load %arg3[%c0, %c0_0] : memref<384x128xf32, #tpu.memory_space<vmem>>, vector<384x128xf32>
    %c0_1 = arith.constant 0 : index
    %c0_2 = arith.constant 0 : index
    %1 = vector.load %arg2[%c0_1, %c0_2] : memref<8x128xf32, #tpu.memory_space<vmem>>, vector<8x128xf32>
    %cst = arith.constant dense<0.000000e+00> : vector<8x384xf32>
    %2 = tpu.matmul %1, %0, %cst {dimension_numbers = #tpu.dot_dimension_numbers<[1], [1], [0], [0], [0, 0, 1, 0], [], []>} : vector<8x128xf32>, vector<384x128xf32>, vector<8x384xf32> -> vector<8x384xf32>
    %c0_3 = arith.constant 0 : index
    %c0_4 = arith.constant 0 : index
    %3 = vector.load %arg4[%c0_3, %c0_4] : memref<8x384xf32, #tpu.memory_space<vmem>>, vector<8x384xf32>
    tpu.vector_store %arg4[%c0_3, %c0_4], %2 {strides = array<i32>} : memref<8x384xf32, #tpu.memory_space<vmem>>, vector<8x384xf32>,
    return
  }
  func.func @transform_0(%arg0: i32, %arg1: i32) -> (i32, i32) {
    %c0_i32 = arith.constant 0 : i32
    %c0_i32_0 = arith.constant 0 : i32
    return %arg0, %c0_i32 : i32, i32
  }
  func.func @transform_1(%arg0: i32, %arg1: i32) -> (i32, i32) {
    %c0_i32 = arith.constant 0 : i32
    %c0_i32_0 = arith.constant 0 : i32
    return %arg1, %c0_i32 : i32, i32
  }
  func.func @transform_2(%arg0: i32, %arg1: i32) -> (i32, i32) {
    %c0_i32 = arith.constant 0 : i32
    return %arg0, %arg1 : i32, i32
  }
}

module attributes {stable_mosaic.version = 11 : i64} {
  func.func @_query_prep_kernel(%arg0: i32, %arg1: memref<8x64xf32, #tpu.memory_space<vmem>>, %arg2: memref<8x64xf32, #tpu.memory_space<vmem>>, %arg3: memref<8x64xf32, #tpu.memory_space<vmem>>, %arg4: memref<8x64xf32, #tpu.memory_space<vmem>>, %arg5: memref<8x128xf32, #tpu.memory_space<vmem>>, %arg6: memref<8x32xf32, #tpu.memory_space<vmem>>, %arg7: memref<8x32xf32, #tpu.memory_space<vmem>>, %arg8: memref<8x32xf32, #tpu.memory_space<vmem>>) attributes {dimension_semantics = [#tpu.dimension_semantics<parallel>], iteration_bounds = array<i64: 1>, scalar_prefetch = 0 : i64, scratch_operands = 0 : i64, tpu.core_type = #tpu.core_type<tc>, window_params = [{transform_indices = @transform_0, window_bounds = array<i64: 8, 64>}, {transform_indices = @transform_1, window_bounds = array<i64: 8, 64>}, {transform_indices = @transform_2, window_bounds = array<i64: 8, 64>}, {transform_indices = @transform_3, window_bounds = array<i64: 8, 64>}, {transform_indices = @transform_4, window_bounds = array<i64: 8, 128>}, {transform_indices = @transform_5, window_bounds = array<i64: 8, 32>}, {transform_indices = @transform_6, window_bounds = array<i64: 8, 32>}, {transform_indices = @transform_7, window_bounds = array<i64: 8, 32>}]} {
    %c0 = arith.constant 0 : index
    %c0_0 = arith.constant 0 : index
    %0 = vector.load %arg1[%c0, %c0_0] : memref<8x64xf32, #tpu.memory_space<vmem>>, vector<8x64xf32>
    %c0_1 = arith.constant 0 : index
    %c0_2 = arith.constant 0 : index
    %1 = vector.load %arg2[%c0_1, %c0_2] : memref<8x64xf32, #tpu.memory_space<vmem>>, vector<8x64xf32>
    %c0_3 = arith.constant 0 : index
    %c0_4 = arith.constant 0 : index
    %2 = vector.load %arg3[%c0_3, %c0_4] : memref<8x64xf32, #tpu.memory_space<vmem>>, vector<8x64xf32>
    %c0_5 = arith.constant 0 : index
    %c0_6 = arith.constant 0 : index
    %3 = vector.load %arg4[%c0_5, %c0_6] : memref<8x64xf32, #tpu.memory_space<vmem>>, vector<8x64xf32>
    %4 = vector.extract_strided_slice %0 {offsets = [0, 0], sizes = [8, 32], strides = [1, 1]} : vector<8x64xf32> to vector<8x32xf32>
    %5 = vector.extract_strided_slice %0 {offsets = [0, 32], sizes = [8, 32], strides = [1, 1]} : vector<8x64xf32> to vector<8x32xf32>
    %6 = vector.extract_strided_slice %1 {offsets = [0, 0], sizes = [8, 32], strides = [1, 1]} : vector<8x64xf32> to vector<8x32xf32>
    %7 = vector.extract_strided_slice %1 {offsets = [0, 32], sizes = [8, 32], strides = [1, 1]} : vector<8x64xf32> to vector<8x32xf32>
    %8 = vector.extract_strided_slice %2 {offsets = [0, 0], sizes = [8, 32], strides = [1, 1]} : vector<8x64xf32> to vector<8x32xf32>
    %9 = vector.extract_strided_slice %2 {offsets = [0, 32], sizes = [8, 32], strides = [1, 1]} : vector<8x64xf32> to vector<8x32xf32>
    %10 = vector.extract_strided_slice %3 {offsets = [0, 0], sizes = [8, 32], strides = [1, 1]} : vector<8x64xf32> to vector<8x32xf32>
    %11 = vector.extract_strided_slice %3 {offsets = [0, 32], sizes = [8, 32], strides = [1, 1]} : vector<8x64xf32> to vector<8x32xf32>
    %12 = arith.mulf %6, %8 : vector<8x32xf32>
    %13 = arith.mulf %7, %9 : vector<8x32xf32>
    %14 = arith.subf %12, %13 : vector<8x32xf32>
    %15 = arith.mulf %7, %8 : vector<8x32xf32>
    %16 = arith.mulf %6, %9 : vector<8x32xf32>
    %17 = arith.addf %15, %16 : vector<8x32xf32>
    %18 = arith.mulf %4, %14 : vector<8x32xf32>
    %19 = arith.mulf %5, %17 : vector<8x32xf32>
    %20 = arith.subf %18, %19 : vector<8x32xf32>
    %21 = arith.mulf %5, %14 : vector<8x32xf32>
    %22 = arith.mulf %4, %17 : vector<8x32xf32>
    %23 = arith.addf %21, %22 : vector<8x32xf32>
    %cst = arith.constant 0.000000e+00 : f32
    %24 = vector.broadcast %cst : f32 to vector<8x128xf32>
    %c0_7 = arith.constant 0 : index
    %c0_8 = arith.constant 0 : index
    %25 = vector.load %arg5[%c0_7, %c0_8] : memref<8x128xf32, #tpu.memory_space<vmem>>, vector<8x128xf32>
    tpu.vector_store %arg5[%c0_7, %c0_8], %24 {strides = array<i32>} : memref<8x128xf32, #tpu.memory_space<vmem>>, vector<8x128xf32>,
    %c0_9 = arith.constant 0 : index
    %c0_10 = arith.constant 0 : index
    %26 = vector.load %arg5[%c0_9, %c0_10] : memref<8x128xf32, #tpu.memory_space<vmem>>, vector<8x32xf32>
    tpu.vector_store %arg5[%c0_9, %c0_10], %20 {strides = array<i32>} : memref<8x128xf32, #tpu.memory_space<vmem>>, vector<8x32xf32>,
    %c0_11 = arith.constant 0 : index
    %c32 = arith.constant 32 : index
    %27 = vector.load %arg5[%c0_11, %c32] : memref<8x128xf32, #tpu.memory_space<vmem>>, vector<8x32xf32>
    tpu.vector_store %arg5[%c0_11, %c32], %23 {strides = array<i32>} : memref<8x128xf32, #tpu.memory_space<vmem>>, vector<8x32xf32>,
    %28 = arith.mulf %4, %4 : vector<8x32xf32>
    %29 = arith.mulf %5, %5 : vector<8x32xf32>
    %30 = arith.addf %28, %29 : vector<8x32xf32>
    %31 = math.sqrt %30 : vector<8x32xf32>
    %c0_12 = arith.constant 0 : index
    %c0_13 = arith.constant 0 : index
    %32 = vector.load %arg6[%c0_12, %c0_13] : memref<8x32xf32, #tpu.memory_space<vmem>>, vector<8x32xf32>
    tpu.vector_store %arg6[%c0_12, %c0_13], %31 {strides = array<i32>} : memref<8x32xf32, #tpu.memory_space<vmem>>, vector<8x32xf32>,
    %33 = arith.mulf %14, %14 : vector<8x32xf32>
    %34 = arith.mulf %17, %17 : vector<8x32xf32>
    %35 = arith.addf %33, %34 : vector<8x32xf32>
    %36 = math.sqrt %35 : vector<8x32xf32>
    %c0_14 = arith.constant 0 : index
    %c0_15 = arith.constant 0 : index
    %37 = vector.load %arg7[%c0_14, %c0_15] : memref<8x32xf32, #tpu.memory_space<vmem>>, vector<8x32xf32>
    tpu.vector_store %arg7[%c0_14, %c0_15], %36 {strides = array<i32>} : memref<8x32xf32, #tpu.memory_space<vmem>>, vector<8x32xf32>,
    %38 = arith.mulf %10, %10 : vector<8x32xf32>
    %39 = arith.mulf %11, %11 : vector<8x32xf32>
    %40 = arith.addf %38, %39 : vector<8x32xf32>
    %41 = math.sqrt %40 : vector<8x32xf32>
    %c0_16 = arith.constant 0 : index
    %c0_17 = arith.constant 0 : index
    %42 = vector.load %arg8[%c0_16, %c0_17] : memref<8x32xf32, #tpu.memory_space<vmem>>, vector<8x32xf32>
    tpu.vector_store %arg8[%c0_16, %c0_17], %41 {strides = array<i32>} : memref<8x32xf32, #tpu.memory_space<vmem>>, vector<8x32xf32>,
    return
  }
  func.func @transform_0(%arg0: i32) -> (i32, i32) {
    %c0_i32 = arith.constant 0 : i32
    %c0_i32_0 = arith.constant 0 : i32
    return %arg0, %c0_i32 : i32, i32
  }
  func.func @transform_1(%arg0: i32) -> (i32, i32) {
    %c0_i32 = arith.constant 0 : i32
    %c0_i32_0 = arith.constant 0 : i32
    return %arg0, %c0_i32 : i32, i32
  }
  func.func @transform_2(%arg0: i32) -> (i32, i32) {
    %c0_i32 = arith.constant 0 : i32
    %c0_i32_0 = arith.constant 0 : i32
    return %arg0, %c0_i32 : i32, i32
  }
  func.func @transform_3(%arg0: i32) -> (i32, i32) {
    %c0_i32 = arith.constant 0 : i32
    %c0_i32_0 = arith.constant 0 : i32
    return %arg0, %c0_i32 : i32, i32
  }
  func.func @transform_4(%arg0: i32) -> (i32, i32) {
    %c0_i32 = arith.constant 0 : i32
    %c0_i32_0 = arith.constant 0 : i32
    return %arg0, %c0_i32 : i32, i32
  }
  func.func @transform_5(%arg0: i32) -> (i32, i32) {
    %c0_i32 = arith.constant 0 : i32
    %c0_i32_0 = arith.constant 0 : i32
    return %arg0, %c0_i32 : i32, i32
  }
  func.func @transform_6(%arg0: i32) -> (i32, i32) {
    %c0_i32 = arith.constant 0 : i32
    %c0_i32_0 = arith.constant 0 : i32
    return %arg0, %c0_i32 : i32, i32
  }
  func.func @transform_7(%arg0: i32) -> (i32, i32) {
    %c0_i32 = arith.constant 0 : i32
    %c0_i32_0 = arith.constant 0 : i32
    return %arg0, %c0_i32 : i32, i32
  }
}

</mosaic_0001>

<bundles_post_ra>
// kernel: tcomplex_forward.3
= control target key start
LH: loop header
LB: loop body
LE: loop exit
PB: predicated region body
PF: predicated region fallthrough
CT: control target
= control target key end

     0   :  { %s333_s0 = inlined_call_operand.vmem [shape: f32[8,128], index: 0, kind: input, shape index: {}]   ;;  %s334_s1 = inlined_call_operand.vmem [shape: f32[384,128], index: 1, kind: input, shape index: {}]   ;;  %s335_s2 = inlined_call_operand.hbm [shape: f32[8,384], index: 2, kind: output, shape index: {}]  }
   0x1   :  { %v59_v0 = vld [vmem:[%s334_s1 + $0x178] sm:$0xff]  ;;  %v58_v3 = vld [vmem:[%s334_s1 + $0x170] sm:$0xff]  ;;  %v57_v6 = vld [vmem:[%s334_s1 + $0x168] sm:$0xff] }
   0x2   :  { %v27_v1 = vld [vmem:[%s334_s1 + $0x78] sm:$0xff]  ;;  %101 = vmatpush.xpose.msra.mxu2 %v59_v0  ;;  %v26_v4 = vld [vmem:[%s334_s1 + $0x70] sm:$0xff]  ;;  %v25_v7 = vld [vmem:[%s334_s1 + $0x68] sm:$0xff] }
   0x3   :  { %61 = vmatpush.xpose.msra.mxu0 %v27_v1  ;;  %v43_v2 = vld [vmem:[%s334_s1 + $0xf8] sm:$0xff]  ;;  %v42_v5 = vld [vmem:[%s334_s1 + $0xf0] sm:$0xff]  ;;  %v41_v8 = vld [vmem:[%s334_s1 + $0xe8] sm:$0xff] }
   0x4   :  { %81 = vmatpush.xpose.msra.mxu1 %v43_v2  ;;  %v56_v9 = vld [vmem:[%s334_s1 + $0x160] sm:$0xff] }
   0x5   :  { %v24_v10 = vld [vmem:[%s334_s1 + $0x60] sm:$0xff] }
   0x6   :  { %102 = vmatpush.xpose.msra.mxu2 %v58_v3 }
   0x7   :  { %62 = vmatpush.xpose.msra.mxu0 %v26_v4 }
   0x8   :  { %82 = vmatpush.xpose.msra.mxu1 %v42_v5 }
   0xa   :  { %103 = vmatpush.xpose.msra.mxu2 %v57_v6 }
   0xb   :  { %63 = vmatpush.xpose.msra.mxu0 %v25_v7 }
   0xc   :  { %83 = vmatpush.xpose.msra.mxu1 %v41_v8 }
   0xd   :  { %7 = vsyncpa [#allocation3], 0  ;;  %v40_v11 = vld [vmem:[%s334_s1 + $0xe0] sm:$0xff]  ;;  %v55_v12 = vld [vmem:[%s334_s1 + $0x158] sm:$0xff]  ;;  %s167_s23 = smov [#allocation2]  }
   0xe   :  { %104 = vmatpush.xpose.msra.mxu2 %v56_v9  ;;  %v23_v13 = vld [vmem:[%s334_s1 + $0x58] sm:$0xff]  ;;  %v54_v15 = vld [vmem:[%s334_s1 + $0x150] sm:$0xff]  ;;  %v53_v18 = vld [vmem:[%s334_s1 + $0x148] sm:$0xff]  ;;  %s129_s24 = sshll.u32 %s167_s23, 4  ;;  %s130_s24 = int_to_ptr.vmem [resolvable:$true] %s129_s24 }
   0xf   :  { %64 = vmatpush.xpose.msra.mxu0 %v24_v10  ;;  %v39_v14 = vld [vmem:[%s334_s1 + $0xd8] sm:$0xff]  ;;  %v22_v16 = vld [vmem:[%s334_s1 + $0x50] sm:$0xff]  ;;  %v21_v19 = vld [vmem:[%s334_s1 + $0x48] sm:$0xff] }
  0x10   :  { %84 = vmatpush.xpose.msra.mxu1 %v40_v11  ;;  %v38_v17 = vld [vmem:[%s334_s1 + $0xd0] sm:$0xff]  ;;  %v37_v20 = vld [vmem:[%s334_s1 + $0xc8] sm:$0xff]  ;;  %v52_v21 = vld [vmem:[%s334_s1 + $0x140] sm:$0xff] }
  0x11   :  { %v20_v22 = vld [vmem:[%s334_s1 + $0x40] sm:$0xff]  ;;  %v51_v24 = vld [vmem:[%s334_s1 + $0x138] sm:$0xff]  ;;  %v50_v27 = vld [vmem:[%s334_s1 + $0x130] sm:$0xff] }
  0x12   :  { %105 = vmatpush.xpose.msra.mxu2 %v55_v12  ;;  %v36_v23 = vld [vmem:[%s334_s1 + $0xc0] sm:$0xff]  ;;  %v19_v25 = vld [vmem:[%s334_s1 + $0x38] sm:$0xff]  ;;  %v18_v28 = vld [vmem:[%s334_s1 + $0x30] sm:$0xff] }
  0x13   :  { %65 = vmatpush.xpose.msra.mxu0 %v23_v13  ;;  %v35_v26 = vld [vmem:[%s334_s1 + $0xb8] sm:$0xff]  ;;  %v34_v29 = vld [vmem:[%s334_s1 + $0xb0] sm:$0xff]  ;;  %v49_v30 = vld [vmem:[%s334_s1 + $0x128] sm:$0xff] }
  0x14   :  { %85 = vmatpush.xpose.msra.mxu1 %v39_v14  ;;  %v17_v31 = vld [vmem:[%s334_s1 + $0x28] sm:$0xff]  ;;  %v48_v33 = vld [vmem:[%s334_s1 + $0x120] sm:$0xff]  ;;  %v47_v36 = vld [vmem:[%s334_s1 + $0x118] sm:$0xff] }
  0x15   :  { %v33_v32 = vld [vmem:[%s334_s1 + $0xa8] sm:$0xff]  ;;  %v16_v34 = vld [vmem:[%s334_s1 + $0x20] sm:$0xff]  ;;  %v15_v37 = vld [vmem:[%s334_s1 + $0x18] sm:$0xff] }
  0x16   :  { %106 = vmatpush.xpose.msra.mxu2 %v54_v15  ;;  %v32_v35 = vld [vmem:[%s334_s1 + $0xa0] sm:$0xff]  ;;  %v31_v38 = vld [vmem:[%s334_s1 + $0x98] sm:$0xff]  ;;  %v46_v39 = vld [vmem:[%s334_s1 + $0x110] sm:$0xff] }
  0x17   :  { %66 = vmatpush.xpose.msra.mxu0 %v22_v16  ;;  %v14_v40 = vld [vmem:[%s334_s1 + $0x10] sm:$0xff]  ;;  %v45_v42 = vld [vmem:[%s334_s1 + $0x108] sm:$0xff]  ;;  %v44_v45 = vld [vmem:[%s334_s1 + $0x100] sm:$0xff] }
  0x18   :  { %86 = vmatpush.xpose.msra.mxu1 %v38_v17  ;;  %v30_v41 = vld [vmem:[%s334_s1 + $0x90] sm:$0xff]  ;;  %v13_v43 = vld [vmem:[%s334_s1 + $0x8] sm:$0xff]  ;;  %v12_v46 = vld [vmem:[%s334_s1] sm:$0xff] }
  0x19   :  { %v29_v44 = vld [vmem:[%s334_s1 + $0x88] sm:$0xff]  ;;  %v28_v47 = vld [vmem:[%s334_s1 + $0x80] sm:$0xff]  ;;  %s131_s1 = sshll.u32 %s335_s2, 4  ;;  %s132_s1 = int_to_ptr.hbm [resolvable:$true] %s131_s1 }
  0x1a   :  { %107 = vmatpush.xpose.msra.mxu2 %v53_v18  ;;  %v60_v48 = vld [vmem:[%s333_s0] sm:$0xff] }
  0x1b   :  { %67 = vmatpush.xpose.msra.mxu0 %v21_v19 }
  0x1c   :  { %87 = vmatpush.xpose.msra.mxu1 %v37_v20 }
  0x1e   :  { %108 = vmatpush.xpose.msra.mxu2 %v52_v21 }
  0x1f   :  { %68 = vmatpush.xpose.msra.mxu0 %v20_v22 }
  0x20   :  { %88 = vmatpush.xpose.msra.mxu1 %v36_v23 }
  0x22   :  { %109 = vmatpush.xpose.msra.mxu2 %v51_v24 }
  0x23   :  { %69 = vmatpush.xpose.msra.mxu0 %v19_v25 }
  0x24   :  { %89 = vmatpush.xpose.msra.mxu1 %v35_v26 }
  0x26   :  { %110 = vmatpush.xpose.msra.mxu2 %v50_v27 }
  0x27   :  { %70 = vmatpush.xpose.msra.mxu0 %v18_v28 }
  0x28   :  { %90 = vmatpush.xpose.msra.mxu1 %v34_v29 }
  0x2a   :  { %111 = vmatpush.xpose.msra.mxu2 %v49_v30 }
  0x2b   :  { %71 = vmatpush.xpose.msra.mxu0 %v17_v31 }
  0x2c   :  { %91 = vmatpush.xpose.msra.mxu1 %v33_v32 }
  0x2e   :  { %112 = vmatpush.xpose.msra.mxu2 %v48_v33 }
  0x2f   :  { %72 = vmatpush.xpose.msra.mxu0 %v16_v34 }
  0x30   :  { %92 = vmatpush.xpose.msra.mxu1 %v32_v35 }
  0x32   :  { %113 = vmatpush.xpose.msra.mxu2 %v47_v36 }
  0x33   :  { %73 = vmatpush.xpose.msra.mxu0 %v15_v37 }
  0x34   :  { %93 = vmatpush.xpose.msra.mxu1 %v31_v38 }
  0x36   :  { %114 = vmatpush.xpose.msra.mxu2 %v46_v39 }
  0x37   :  { %74 = vmatpush.xpose.msra.mxu0 %v14_v40 }
  0x38   :  { %94 = vmatpush.xpose.msra.mxu1 %v30_v41 }
  0x3a   :  { %115 = vmatpush.xpose.msra.mxu2 %v45_v42 }
  0x3b   :  { %75 = vmatpush.xpose.msra.mxu0 %v13_v43 }
  0x3c   :  { %95 = vmatpush.xpose.msra.mxu1 %v29_v44 }
  0x3e   :  { %116 = vmatpush.xpose.msra.mxu2 %v44_v45 }
  0x3f   :  { %76 = vmatpush.xpose.msra.mxu0 %v12_v46 }
  0x40   :  { %96 = vmatpush.xpose.msra.mxu1 %v28_v47 }
  0x41   :  { %117 = vmatmul.f32.vlgmr.msra.gmra.mxu2 %v60_v48 }
  0x42   :  { %77 = vmatmul.f32.vlgmr.msra.gmra.mxu0 %v60_v48 }
  0x43   :  { %97 = vmatmul.f32.vlgmr.msra.gmra.mxu1 %v60_v48 }
  0xbf   :  { %v78_v49 = vpop.f32.mrf.mxu0 }
  0xc0   :  { %121 = vst [vmem:[#allocation2] sm:$0xff] %v78_v49  ;;  %v98_v50 = vpop.f32.mrf.mxu1 }
  0xc1   :  { %122 = vst [vmem:[#allocation2 + $0x8] sm:$0xff] %v98_v50 }
  0xc4   :  { %v118_v51 = vpop.f32.mrf.mxu2 }
  0xc5   :  { %123 = vst [vmem:[#allocation2 + $0x10] sm:$0xff] %v118_v51 }
  0xc6   :  { %134 = dma.vmem_to_hbm [thread:$0]  %s130_s24, 384, %s132_s1, [#allocation3]  }
  0xc7   :  { %165 = dma.done.wait [#allocation3], 384  }
  0xc8   :  { %166 = vsyncadd [#allocation3], 4294966912 }
  0xc9   :  { %139 = vsyncpa [#allocation3], 1 }

// kernel: tcomplex_forward.2
= control target key start
LH: loop header
LB: loop body
LE: loop exit
PB: predicated region body
PF: predicated region fallthrough
CT: control target
= control target key end

     0   :  { %13 = vsyncpa [#allocation3], 0  ;;  %s359_s0 = inlined_call_operand.vmem [shape: f32[8,64], index: 0, kind: input, shape index: {}]   ;;  %s360_s1 = inlined_call_operand.vmem [shape: f32[8,64], index: 1, kind: input, shape index: {}]   ;;  %s361_s2 = inlined_call_operand.vmem [shape: f32[8,64], index: 2, kind: input, shape index: {}]   ;;  %s362_s3 = inlined_call_operand.vmem [shape: f32[8,64], index: 3, kind: input, shape index: {}]   ;;  %s363_s4 = inlined_call_operand.vmem [shape: f32[8,128], index: 4, kind: output, shape index: {0}]   ;;  %s364_s5 = inlined_call_operand.hbm [shape: f32[8,32], index: 5, kind: output, shape index: {1}]   ;;  %s365_s6 = inlined_call_operand.hbm [shape: f32[8,32], index: 6, kind: output, shape index: {2}]   ;;  %s366_s7 = inlined_call_operand.hbm [shape: f32[8,32], index: 7, kind: output, shape index: {3}]  }
   0x1   :  { %v25_v0 = vld [vmem:[%s361_s2] sm:$0xff] }
   0x2   :  { %14 = vsyncpa [#allocation5], 0  ;;  %s271_s26 = smov 96   ;;  %s272_s27 = smov 32   ;;  %v323_v1 = vld [vmem:[%s359_s0] sm:$0xff]  ;;  %v273_v17 = vmov 0.0  }
   0x3   :  { %38 = vrot.lane.b32.xlu0 %v25_v0, %s271_s26  ;;  %v74_v2 = vmul.f32 %v323_v1, %v323_v1  ;;  %v24_v3 = vld [vmem:[%s360_s1] sm:$0xff]  ;;  %69 = vst [vmem:[%s363_s4] sm:$0xff] %v273_v17  ;;  %vm70_vm0 = vcmask 261120   ;;  %s152_s13 = sshll.u32 %s365_s6, 4  ;;  %s275_s6 = smov [#allocation2]   ;;  %vm72_vm7 = vcmask 523520   ;;  %s153_s13 = int_to_ptr.hbm [resolvable:$true] %s152_s13 }
   0x4   :  { %v27_v6 = vmul.f32 %v25_v0, %v24_v3  ;;  %v26_v7 = vld [vmem:[%s362_s3] sm:$0xff]  ;;  %s274_s3 = smov [#allocation4]   ;;  %s139_s16 = sshll.u32 %s275_s6, 4  ;;  %s140_s16 = int_to_ptr.vmem [resolvable:$true] %s139_s16 }
   0x5   :  { %v113_v8 = vmul.f32 %v26_v7, %v26_v7  ;;  %s150_s10 = sshll.u32 %s274_s3, 4  ;;  %s141_s19 = sshll.u32 %s364_s5, 4  ;;  %s151_s10 = int_to_ptr.vmem [resolvable:$true] %s150_s10  ;;  %s142_s19 = int_to_ptr.hbm [resolvable:$true] %s141_s19 }
   0x6   :  { %s276_s20 = smov [#allocation6]   ;;  %s163_s24 = sshll.u32 %s366_s7, 4  ;;  %s164_s24 = int_to_ptr.hbm [resolvable:$true] %s163_s24 }
   0x7   :  { %s161_s21 = sshll.u32 %s276_s20, 4  ;;  %s162_s21 = int_to_ptr.vmem [resolvable:$true] %s161_s21 }
   0xb   :  { %34 = vrot.lane.b32.xlu0 %v25_v0, %s272_s27 }
  0x13   :  { %76 = vrot.lane.b32.xlu0 %v74_v2, %s271_s26 }
  0x75   :  { %v39_v4 = vpop.permute.xlu0 %38 }
  0x76   :  { %v41_v5 = vmul.f32 %v39_v4, %v24_v3 }
  0x78   :  { %43 = vrot.lane.b32.xlu1 %v41_v5, %s272_s27 }
  0x7d   :  { %v35_v9 = vpop.permute.xlu0 %34 }
  0x7e   :  { %v37_v10 = vmul.f32 %v35_v9, %v24_v3 }
  0x80   :  { %29 = vrot.lane.b32.xlu1 %v27_v6, %s271_s26 }
  0x85   :  { %v77_v23 = vpop.permute.xlu0 %76 }
  0x86   :  { %v79_v38 = vadd.f32 %v77_v23, %v74_v2 }
  0x88   :  { %115 = vrot.lane.b32.xlu1 %v113_v8, %s271_s26  ;;  %vm87_vm3 = vcmp.eq.f32.partialorder %v79_v38, inf  ;;  %v90_v54 = vand.u32 2147483648, %v79_v38  ;;  %vm89_vm5 = vcmp.eq.f32.partialorder %v79_v38, 0.0 }
  0xea   :  { %v44_v11 = vpop.permute.xlu1 %43 }
  0xeb   :  { %v46_v12 = vadd.f32 %v44_v11, %v37_v10 }
  0xed   :  { %60 = vrot.lane.b32.xlu2 %v46_v12, %s271_s26  ;;  %v48_v13 = vmul.f32 %v46_v12, %v323_v1  ;;  %v94_v14 = vmul.f32 %v46_v12, %v46_v12 }
  0xef   :  { %50 = vrot.lane.b32.xlu0 %v48_v13, %s271_s26 }
  0xf2   :  { %v30_v15 = vpop.permute.xlu1 %29 }
  0xf3   :  { %v32_v16 = vsub.f32 %v27_v6, %v30_v15 }
  0xf5   :  { %96 = vrot.lane.b32.xlu2 %v94_v14, %s271_s26  ;;  %v93_v20 = vmul.f32 %v32_v16, %v32_v16  ;;  %v47_v28 = vmul.f32 %v32_v16, %v323_v1 }
  0xfa   :  { %v116_v37 = vpop.permute.xlu1 %115 }
  0xfb   :  { %v118_v39 = vadd.f32 %v116_v37, %v113_v8 }
  0xfd   :  { %55 = vrot.lane.b32.xlu2 %v32_v16, %s272_s27  ;;  %vm126_vm4 = vcmp.eq.f32.partialorder %v118_v39, inf  ;;  %vm128_vm6 = vcmp.eq.f32.partialorder %v118_v39, 0.0  ;;  %v129_v58 = vand.u32 2147483648, %v118_v39 }
 0x147   :  { %v61_v18 = vpop.permute.xlu2 %60 }
 0x148   :  { %v63_v19 = vmul.f32 %v61_v18, %v323_v1 }
 0x14a   :  { %65 = vrot.lane.b32.xlu1 %v63_v19, %s272_s27 }
 0x14f   :  { %v97_v21 = vpop.permute.xlu2 %96 }
 0x150   :  { %v99_v22 = vadd.f32 %v97_v21, %v93_v20 }
 0x152   :  { %189 = vrsqrt.f32 %v99_v22  ;;  %vm107_vm1 = vcmp.eq.f32.partialorder %v99_v22, inf  ;;  %v110_v34 = vand.u32 2147483648, %v99_v22  ;;  %vm109_vm2 = vcmp.eq.f32.partialorder %v99_v22, 0.0 }
 0x153   :  { %191 = vrsqrt.f32 %v79_v38 }
 0x154   :  { %193 = vrsqrt.f32 %v118_v39 }
 0x157   :  { %v56_v60 = vpop.permute.xlu2 %55 }
 0x158   :  { %v190_v24 = vpop.eup %189  ;;  %v58_v61 = vmul.f32 %v56_v60, %v323_v1 }
 0x159   :  { %v101_v25 = vmul.f32 %v190_v24, %v99_v22  ;;  %v192_v40 = vpop.eup %191 }
 0x15a   :  { %v194_v41 = vpop.eup %193  ;;  %v81_v42 = vmul.f32 %v192_v40, %v79_v38 }
 0x15b   :  { %v102_v26 = vmul.f32 %v190_v24, %v101_v25  ;;  %v120_v43 = vmul.f32 %v194_v41, %v118_v39 }
 0x15c   :  { %v82_v44 = vmul.f32 %v192_v40, %v81_v42 }
 0x15d   :  { %v103_v27 = vmul.f32 0.5, %v102_v26  ;;  %v121_v45 = vmul.f32 %v194_v41, %v120_v43 }
 0x15e   :  { %v83_v46 = vmul.f32 0.5, %v82_v44 }
 0x15f   :  { %v104_v29 = vsub.f32 1.5, %v103_v27  ;;  %v122_v47 = vmul.f32 0.5, %v121_v45 }
 0x160   :  { %v84_v48 = vsub.f32 1.5, %v83_v46 }
 0x161   :  { %v51_v30 = vpop.permute.xlu0 %50  ;;  %v105_v31 = vmul.f32 %v190_v24, %v104_v29  ;;  %v123_v49 = vsub.f32 1.5, %v122_v47 }
 0x162   :  { %v53_v32 = vsub.f32 %v47_v28, %v51_v30  ;;  %v85_v50 = vmul.f32 %v192_v40, %v84_v48 }
 0x163   :  { %v106_v33 = vmul.f32 %v105_v31, %v99_v22  ;;  %v124_v51 = vmul.f32 %v194_v41, %v123_v49 }
 0x164   :  { %71 = vst.msk [vmem:[%s363_s4] sm:$0xff] %vm70_vm0, %v53_v32  ;;  %v86_v52 = vmul.f32 %v85_v50, %v79_v38 }
 0x165   :  { %v108_v35 = vsel %vm107_vm1, %v99_v22, %v106_v33  ;;  %v125_v53 = vmul.f32 %v124_v51, %v118_v39 }
 0x166   :  { %v111_v36 = vsel %vm109_vm2, %v110_v34, %v108_v35  ;;  %v88_v55 = vsel %vm87_vm3, %v79_v38, %v86_v52 }
 0x167   :  { %112 = vst.msk [vmem:[#allocation4] sm:$0xff] %vm70_vm0, %v111_v36  ;;  %v127_v56 = vsel %vm126_vm4, %v118_v39, %v125_v53  ;;  %v91_v57 = vsel %vm89_vm5, %v90_v54, %v88_v55 }
 0x168   :  { %155 = dma.vmem_to_hbm [thread:$0]  %s151_s10, 128, %s153_s13, [#allocation5]   ;;  %92 = vst.msk [vmem:[#allocation2] sm:$0xff] %vm70_vm0, %v91_v57  ;;  %v130_v59 = vsel %vm128_vm6, %v129_v58, %v127_v56 }
 0x169   :  { %144 = dma.vmem_to_hbm [thread:$0]  %s140_s16, 128, %s142_s19, [#allocation3]   ;;  %131 = vst.msk [vmem:[#allocation6] sm:$0xff] %vm70_vm0, %v130_v59 }
 0x16a   :  { %166 = dma.vmem_to_hbm [thread:$0]  %s162_s21, 128, %s164_s24, [#allocation5]  }
 0x1bc   :  { %v66_v62 = vpop.permute.xlu1 %65 }
 0x1bd   :  { %v68_v63 = vadd.f32 %v66_v62, %v58_v61 }
 0x1bf   :  { %73 = vst.msk [vmem:[%s363_s4] sm:$0xff] %vm72_vm7, %v68_v63 }
 0x1c0   :  { %267 = dma.done.wait [#allocation3], 128  }
 0x1c1   :  { %268 = vsyncadd [#allocation3], 4294967168 }
 0x1c2   :  { %269 = dma.done.wait [#allocation5], 256  }
 0x1c3   :  { %270 = vsyncadd [#allocation5], 4294967040 }
 0x1c4   :  { %181 = vsyncpa [#allocation3], 1 }
 0x1c5   :  { %182 = vsyncpa [#allocation5], 1 }

</bundles_post_ra>
